<compile_context>
chip_gen: v6e
topology: v6e:2x2x1
jax: 0.10.0
libtpu: 0.0.40
codegen_flags: <defaults>
</compile_context>

<pallas_src>
import functools

import jax
import jax.numpy as jnp
from jax import lax
from jax.experimental import pallas as pl
from jax.experimental.pallas import tpu as pltpu


def _round_up(x, m):
    return (x + m - 1) // m * m


def _cnn_kernel(ids_ref, lut_ref, w1_ref, b1_ref, w2_ref, b2_ref, out_ref, *,
                ksize, seq_len, block_b, vocab_pad):
    # ids_ref : (TB*L, 1)   int32  token ids for this batch block (batch-major)
    # lut_ref : (Vp, E)     bf16   embedding table (VMEM resident)
    # w1_ref  : (K*E, H)    bf16   conv1 im2col weights (rows ordered tap, in_ch)
    # b1_ref  : (1, H)      f32
    # w2_ref  : (K*H, Hp)   bf16   conv2 im2col weights (output lanes padded)
    # b2_ref  : (1, Hp)     f32
    # out_ref : (TB, Hp)    f32    per-batch max over valid positions
    k = ksize
    l = seq_len
    rows = block_b * l                       # flat activation rows this step
    l2 = l - 2 * (k - 1)                     # conv2 valid length per batch elem
    r1 = rows - (k - 1)                      # flat conv1 rows (some invalid)
    r2 = r1 - (k - 1)                        # flat conv2 rows (some invalid)
    hp = out_ref.shape[1]

    # ---- fused embedding gather: one-hot (rows, Vp) @ lut (Vp, E) on the MXU ----
    ids = ids_ref[...]                                           # (rows, 1) int32
    vocab_ids = lax.broadcasted_iota(jnp.int32, (rows, vocab_pad), 1)
    onehot = (ids == vocab_ids).astype(lut_ref.dtype)            # bf16 0/1
    x = jnp.dot(onehot, lut_ref[...],
                preferred_element_type=jnp.float32)              # (rows, E) f32
    x = x.astype(w1_ref.dtype)                                   # bf16

    # ---- conv1 + ReLU: one im2col matmul, contraction K*E (< 128 here) ----
    p1 = jnp.concatenate([x[j:j + r1, :] for j in range(k)], axis=-1)
    h1 = jnp.dot(p1, w1_ref[...], preferred_element_type=jnp.float32)
    h1 = jnp.maximum(h1 + b1_ref[...], 0.0)                      # f32 (r1, H)
    h1 = h1.astype(w2_ref.dtype)                                 # bf16

    # ---- conv2 + ReLU: im2col over the H real channels (contraction K*H) ----
    p2 = jnp.concatenate([h1[j:j + r2, :] for j in range(k)], axis=-1)
    h2 = jnp.dot(p2, w2_ref[...], preferred_element_type=jnp.float32)
    h2 = jnp.maximum(h2 + b2_ref[...], 0.0)                      # f32 (r2, Hp)

    # ---- per-batch-element max over the L2 valid sequence positions ----
    # Flat row b*L + t holds the conv2 output for (batch b, position t); rows
    # with t >= L2 (windows crossing a batch boundary) are masked to 0, which is
    # safe because ReLU guarantees non-negative outputs.
    if l % 8 == 0:
        pad_rows = rows - r2
        if pad_rows:
            h2 = jnp.concatenate(
                [h2, jnp.zeros((pad_rows, hp), h2.dtype)], axis=0)
        h3 = h2.reshape(block_b, l, hp)
        pos = lax.broadcasted_iota(jnp.int32, (block_b, l, hp), 1)
        h3 = jnp.where(pos < l2, h3, 0.0)
        out_ref[...] = jnp.max(h3, axis=1)                       # (TB, Hp)
    else:
        # Fallback (L not a clean sublane multiple): per-batch slice reductions.
        maxes = [jnp.max(h2[b * l:b * l + l2, :], axis=0, keepdims=True)
                 for b in range(block_b)]
        out_ref[...] = jnp.concatenate(maxes, axis=0)


def prepare_cnn_params(lookup_table, w1, b1, w2, b2):
    """One-time formatting of parameters for the kernel (hoisted out of forward).

    PyTorch Conv1d weight (Cout, Cin, K) -> im2col weight (K*Cin, Cout).
    Only the *final* output channel dim is lane-padded to 128; conv1 output /
    conv2 contraction stay at the H real channels.
    """
    vocab, embed = lookup_table.shape
    hidden, _, ksize = w1.shape
    hp = _round_up(hidden, 128)
    vp = _round_up(vocab, 8)

    lut_p = jnp.pad(lookup_table, ((0, vp - vocab), (0, 0))).astype(jnp.bfloat16)
    w1f = jnp.transpose(w1, (2, 1, 0)).reshape(ksize * embed, hidden)
    w1f = w1f.astype(jnp.bfloat16)
    w2f = jnp.transpose(w2, (2, 1, 0)).reshape(ksize * hidden, hidden)
    w2f = jnp.pad(w2f, ((0, 0), (0, hp - hidden))).astype(jnp.bfloat16)
    b1p = b1.reshape(1, hidden).astype(jnp.float32)
    b2p = jnp.pad(b2, (0, hp - hidden)).reshape(1, hp).astype(jnp.float32)
    return lut_p, w1f, b1p, w2f, b2p


@functools.partial(jax.jit, static_argnames=("block_b",))
def cnn_forward(X, lut_p, w1f, b1p, w2f, b2p, *, block_b=16):
    """X: (B, L) int token ids. Returns (B, H) float32 (PyTorch CNN.forward)."""
    B, L = X.shape
    Vp, E = lut_p.shape
    H = w1f.shape[1]
    K = w1f.shape[0] // E
    Hp = w2f.shape[1]
    assert w2f.shape[0] == K * H
    assert L - 2 * (K - 1) >= 1, "sequence too short for two valid convs"

    # ---- per-step batch block selection ----
    Bp8 = _round_up(B, 8)
    bb = max(8, (min(block_b, Bp8) // 8) * 8)
    # Keep >= 2 grid steps when the batch allows it (v7x has 2 TensorCores and
    # the batch axis is the "parallel" one).
    if Bp8 // bb < 2 and Bp8 >= 16:
        bb = max(8, ((Bp8 // 2) // 8) * 8)

    # Rough per-step VMEM live-set (ids, one-hot, x, p1, h1, p2, h2 + masked
    # copy, out); keep well under the v7x scoped default so nothing spills.
    def _live_bytes(bb_):
        rows = bb_ * L
        return (rows * (4 + 2 * Vp + 6 * E)          # ids + onehot + x (f32+bf16)
                + rows * (2 * K * E + 6 * H + 2 * K * H)  # p1 + h1 (f32+bf16) + p2
                + rows * 8 * Hp                      # h2 f32 + masked/reshaped copy
                + bb_ * 4 * Hp)                      # output block
    while bb > 8 and 2 * _live_bytes(bb) > 24 * (1 << 20):
        bb -= 8

    Bp = _round_up(B, bb)
    if Bp != B:
        X = jnp.pad(X, ((0, Bp - B), (0, 0)))
    ids = X.reshape(Bp * L, 1).astype(jnp.int32)     # only 4B/token goes to HBM

    out = pl.pallas_call(
        functools.partial(_cnn_kernel, ksize=K, seq_len=L, block_b=bb,
                          vocab_pad=Vp),
        out_shape=jax.ShapeDtypeStruct((Bp, Hp), jnp.float32),
        grid=(Bp // bb,),
        in_specs=[
            pl.BlockSpec((bb * L, 1), lambda i: (i, 0)),     # token ids
            pl.BlockSpec((Vp, E), lambda i: (0, 0)),         # embedding table
            pl.BlockSpec((K * E, H), lambda i: (0, 0)),      # conv1 weights
            pl.BlockSpec((1, H), lambda i: (0, 0)),          # conv1 bias
            pl.BlockSpec((K * H, Hp), lambda i: (0, 0)),     # conv2 weights
            pl.BlockSpec((1, Hp), lambda i: (0, 0)),         # conv2 bias
        ],
        out_specs=pl.BlockSpec((bb, Hp), lambda i: (i, 0)),
        compiler_params=pltpu.CompilerParams(
            dimension_semantics=("parallel",)),
    )(ids, lut_p, w1f, b1p, w2f, b2p)

    return out[:B, :H]                                        # (B, H)


# ----------------------------- references -----------------------------------

def reference_f32(X, lookup_table, w1, b1, w2, b2):
    """Pure-JAX f32 reference matching PyTorch semantics exactly."""
    emb = lookup_table[X]                             # (B, L, E)
    x = jnp.transpose(emb, (0, 2, 1))                 # (B, E, L)  (NCL)
    h = lax.conv_general_dilated(x, w1, (1,), "VALID",
                                 dimension_numbers=("NCH", "OIH", "NCH"))
    h = jax.nn.relu(h + b1[None, :, None])
    h = lax.conv_general_dilated(h, w2, (1,), "VALID",
                                 dimension_numbers=("NCH", "OIH", "NCH"))
    h = jax.nn.relu(h + b2[None, :, None])
    h = jnp.transpose(h, (0, 2, 1))                   # (B, L2, H)
    return jnp.max(h, axis=1)


def reference_bf16(X, lookup_table, w1, b1, w2, b2):
    """Reference with the kernel's bf16 operand rounding (f32 accumulation)."""
    bf = lambda a: a.astype(jnp.bfloat16).astype(jnp.float32)
    emb = bf(lookup_table)[X]
    x = jnp.transpose(emb, (0, 2, 1))
    h = lax.conv_general_dilated(x, bf(w1), (1,), "VALID",
                                 dimension_numbers=("NCH", "OIH", "NCH"))
    h = jax.nn.relu(h + b1[None, :, None])
    h = bf(h)
    h = lax.conv_general_dilated(h, bf(w2), (1,), "VALID",
                                 dimension_numbers=("NCH", "OIH", "NCH"))
    h = jax.nn.relu(h + b2[None, :, None])
    h = jnp.transpose(h, (0, 2, 1))
    return jnp.max(h, axis=1)


if __name__ == "__main__":
    B, L, VOCAB, E, H, K = 16, 16, 20, 32, 32, 3

    key = jax.random.PRNGKey(0)
    ks = jax.random.split(key, 6)
    lookup_table = jax.random.normal(ks[0], (VOCAB, E), jnp.float32)
    X = jax.random.randint(ks[1], (B, L), 0, VOCAB)
    X_len = jnp.full((B,), L, jnp.int32)  # accepted but unused (parity with nn.Module)

    # Deterministic synthetic parameters (PyTorch Conv1d shapes).
    w1 = jax.random.normal(ks[2], (H, E, K), jnp.float32) * 0.1
    b1 = jax.random.normal(ks[3], (H,), jnp.float32) * 0.1
    w2 = jax.random.normal(ks[4], (H, H, K), jnp.float32) * 0.1
    b2 = jax.random.normal(ks[5], (H,), jnp.float32) * 0.1

    params = prepare_cnn_params(lookup_table, w1, b1, w2, b2)   # init-time prep
    out = cnn_forward(X, *params)
    out = jax.block_until_ready(out)
    assert out.shape == (B, H), out.shape

    # Tight check against a bf16-matched reference + moderate check vs pure f32.
    ref_bf = reference_bf16(X, lookup_table, w1, b1, w2, b2)
    ref_32 = reference_f32(X, lookup_table, w1, b1, w2, b2)
    assert jnp.allclose(out, ref_bf, atol=5e-3, rtol=5e-3), \
        "mismatch vs bf16-matched reference"
    assert jnp.allclose(out, ref_32, atol=5e-2, rtol=2e-2), \
        "mismatch vs f32 reference"
    print("KERNEL_OK")
</pallas_src>

<mosaic_0001>
module attributes {stable_mosaic.version = 11 : i64} {
  func.func @_cnn_kernel(%arg0: i32, %arg1: memref<128x1xi32, #tpu.memory_space<vmem>>, %arg2: memref<24x32xbf16, #tpu.memory_space<vmem>>, %arg3: memref<96x32xbf16, #tpu.memory_space<vmem>>, %arg4: memref<1x32xf32, #tpu.memory_space<vmem>>, %arg5: memref<96x128xbf16, #tpu.memory_space<vmem>>, %arg6: memref<1x128xf32, #tpu.memory_space<vmem>>, %arg7: memref<8x128xf32, #tpu.memory_space<vmem>>) attributes {dimension_semantics = [#tpu.dimension_semantics<parallel>], iteration_bounds = array<i64: 2>, scalar_prefetch = 0 : i64, scratch_operands = 0 : i64, tpu.core_type = #tpu.core_type<tc>, window_params = [{transform_indices = @transform_0, window_bounds = array<i64: 128, 1>}, {pipeline_mode = #tpu.pipeline_mode<synchronous>, transform_indices = @transform_1, window_bounds = array<i64: 24, 32>}, {pipeline_mode = #tpu.pipeline_mode<synchronous>, transform_indices = @transform_2, window_bounds = array<i64: 96, 32>}, {pipeline_mode = #tpu.pipeline_mode<synchronous>, transform_indices = @transform_3, window_bounds = array<i64: 1, 32>}, {pipeline_mode = #tpu.pipeline_mode<synchronous>, transform_indices = @transform_4, window_bounds = array<i64: 96, 128>}, {pipeline_mode = #tpu.pipeline_mode<synchronous>, transform_indices = @transform_5, window_bounds = array<i64: 1, 128>}, {transform_indices = @transform_6, window_bounds = array<i64: 8, 128>}]} {
    %c0 = arith.constant 0 : index
    %c0_0 = arith.constant 0 : index
    %0 = vector.load %arg1[%c0, %c0_0] : memref<128x1xi32, #tpu.memory_space<vmem>>, vector<128x1xi32>
    %1 = tpu.iota {dimensions = array<i32: 1>} : vector<128x24xi32>
    %2 = vector.broadcast %0 : vector<128x1xi32> to vector<128x24xi32>
    %3 = arith.cmpi eq, %2, %1 : vector<128x24xi32>
    %4 = arith.extui %3 : vector<128x24xi1> to vector<128x24xi32>
    %5 = arith.sitofp %4 : vector<128x24xi32> to vector<128x24xf32>
    %6 = arith.truncf %5 : vector<128x24xf32> to vector<128x24xbf16>
    %c0_1 = arith.constant 0 : index
    %c0_2 = arith.constant 0 : index
    %7 = vector.load %arg2[%c0_1, %c0_2] : memref<24x32xbf16, #tpu.memory_space<vmem>>, vector<24x32xbf16>
    %cst = arith.constant dense<0.000000e+00> : vector<128x32xf32>
    %8 = tpu.matmul %6, %7, %cst {dimension_numbers = #tpu.dot_dimension_numbers<[1], [0], [0], [1], [0, 0, 1, 1], [], []>} : vector<128x24xbf16>, vector<24x32xbf16>, vector<128x32xf32> -> vector<128x32xf32>
    %9 = arith.truncf %8 : vector<128x32xf32> to vector<128x32xbf16>
    %10 = vector.extract_strided_slice %9 {offsets = [0, 0], sizes = [126, 32], strides = [1, 1]} : vector<128x32xbf16> to vector<126x32xbf16>
    %11 = vector.extract_strided_slice %9 {offsets = [1, 0], sizes = [126, 32], strides = [1, 1]} : vector<128x32xbf16> to vector<126x32xbf16>
    %12 = vector.extract_strided_slice %9 {offsets = [2, 0], sizes = [126, 32], strides = [1, 1]} : vector<128x32xbf16> to vector<126x32xbf16>
    %13 = tpu.concatenate %10, %11, %12 in 1 : vector<126x32xbf16>, vector<126x32xbf16>, vector<126x32xbf16> -> vector<126x96xbf16>
    %c0_3 = arith.constant 0 : index
    %c0_4 = arith.constant 0 : index
    %14 = vector.load %arg3[%c0_3, %c0_4] : memref<96x32xbf16, #tpu.memory_space<vmem>>, vector<96x32xbf16>
    %cst_5 = arith.constant dense<0.000000e+00> : vector<126x32xf32>
    %15 = tpu.matmul %13, %14, %cst_5 {dimension_numbers = #tpu.dot_dimension_numbers<[1], [0], [0], [1], [0, 0, 1, 1], [], []>} : vector<126x96xbf16>, vector<96x32xbf16>, vector<126x32xf32> -> vector<126x32xf32>
    %c0_6 = arith.constant 0 : index
    %c0_7 = arith.constant 0 : index
    %16 = vector.load %arg4[%c0_6, %c0_7] : memref<1x32xf32, #tpu.memory_space<vmem>>, vector<1x32xf32>
    %17 = vector.broadcast %16 : vector<1x32xf32> to vector<126x32xf32>
    %18 = arith.addf %15, %17 : vector<126x32xf32>
    %cst_8 = arith.constant 0.000000e+00 : f32
    %19 = vector.broadcast %cst_8 : f32 to vector<126x32xf32>
    %20 = arith.maximumf %18, %19 : vector<126x32xf32>
    %21 = arith.truncf %20 : vector<126x32xf32> to vector<126x32xbf16>
    %22 = vector.extract_strided_slice %21 {offsets = [0, 0], sizes = [124, 32], strides = [1, 1]} : vector<126x32xbf16> to vector<124x32xbf16>
    %23 = vector.extract_strided_slice %21 {offsets = [1, 0], sizes = [124, 32], strides = [1, 1]} : vector<126x32xbf16> to vector<124x32xbf16>
    %24 = vector.extract_strided_slice %21 {offsets = [2, 0], sizes = [124, 32], strides = [1, 1]} : vector<126x32xbf16> to vector<124x32xbf16>
    %25 = tpu.concatenate %22, %23, %24 in 1 : vector<124x32xbf16>, vector<124x32xbf16>, vector<124x32xbf16> -> vector<124x96xbf16>
    %c0_9 = arith.constant 0 : index
    %c0_10 = arith.constant 0 : index
    %26 = vector.load %arg5[%c0_9, %c0_10] : memref<96x128xbf16, #tpu.memory_space<vmem>>, vector<96x128xbf16>
    %cst_11 = arith.constant dense<0.000000e+00> : vector<124x128xf32>
    %27 = tpu.matmul %25, %26, %cst_11 {dimension_numbers = #tpu.dot_dimension_numbers<[1], [0], [0], [1], [0, 0, 1, 1], [], []>} : vector<124x96xbf16>, vector<96x128xbf16>, vector<124x128xf32> -> vector<124x128xf32>
    %c0_12 = arith.constant 0 : index
    %c0_13 = arith.constant 0 : index
    %28 = vector.load %arg6[%c0_12, %c0_13] : memref<1x128xf32, #tpu.memory_space<vmem>>, vector<1x128xf32>
    %29 = vector.broadcast %28 : vector<1x128xf32> to vector<124x128xf32>
    %30 = arith.addf %27, %29 : vector<124x128xf32>
    %cst_14 = arith.constant 0.000000e+00 : f32
    %31 = vector.broadcast %cst_14 : f32 to vector<124x128xf32>
    %32 = arith.maximumf %30, %31 : vector<124x128xf32>
    %cst_15 = arith.constant 0.000000e+00 : f32
    %33 = vector.broadcast %cst_15 : f32 to vector<4x128xf32>
    %34 = tpu.concatenate %32, %33 in 0 : vector<124x128xf32>, vector<4x128xf32> -> vector<128x128xf32>
    %35 = vector.shape_cast %34 : vector<128x128xf32> to vector<8x16x128xf32>
    %36 = tpu.iota {dimensions = array<i32: 1>} : vector<8x16x128xi32>
    %c12_i32 = arith.constant 12 : i32
    %37 = vector.broadcast %c12_i32 : i32 to vector<8x16x128xi32>
    %38 = arith.cmpi slt, %36, %37 : vector<8x16x128xi32>
    %cst_16 = arith.constant 0.000000e+00 : f32
    %39 = vector.broadcast %cst_16 : f32 to vector<8x16x128xf32>
    %40 = arith.select %38, %35, %39 : vector<8x16x128xi1>, vector<8x16x128xf32>
    %cst_17 = arith.constant dense<0xFF800000> : vector<8x128xf32>
    %41 = vector.multi_reduction <maximumf>, %40, %cst_17 [1] : vector<8x16x128xf32> to vector<8x128xf32>
    %c0_18 = arith.constant 0 : index
    %c0_19 = arith.constant 0 : index
    %42 = vector.load %arg7[%c0_18, %c0_19] : memref<8x128xf32, #tpu.memory_space<vmem>>, vector<8x128xf32>
    tpu.vector_store %arg7[%c0_18, %c0_19], %41 {strides = array<i32>} : memref<8x128xf32, #tpu.memory_space<vmem>>, vector<8x128xf32>,
    return
  }
  func.func @transform_0(%arg0: i32) -> (i32, i32) {
    %c0_i32 = arith.constant 0 : i32
    %c0_i32_0 = arith.constant 0 : i32
    return %arg0, %c0_i32 : i32, i32
  }
  func.func @transform_1(%arg0: i32) -> (i32, i32) {
    %c0_i32 = arith.constant 0 : i32
    %c0_i32_0 = arith.constant 0 : i32
    %c0_i32_1 = arith.constant 0 : i32
    return %c0_i32, %c0_i32_0 : i32, i32
  }
  func.func @transform_2(%arg0: i32) -> (i32, i32) {
    %c0_i32 = arith.constant 0 : i32
    %c0_i32_0 = arith.constant 0 : i32
    %c0_i32_1 = arith.constant 0 : i32
    return %c0_i32, %c0_i32_0 : i32, i32
  }
  func.func @transform_3(%arg0: i32) -> (i32, i32) {
    %c0_i32 = arith.constant 0 : i32
    %c0_i32_0 = arith.constant 0 : i32
    %c0_i32_1 = arith.constant 0 : i32
    return %c0_i32, %c0_i32_0 : i32, i32
  }
  func.func @transform_4(%arg0: i32) -> (i32, i32) {
    %c0_i32 = arith.constant 0 : i32
    %c0_i32_0 = arith.constant 0 : i32
    %c0_i32_1 = arith.constant 0 : i32
    return %c0_i32, %c0_i32_0 : i32, i32
  }
  func.func @transform_5(%arg0: i32) -> (i32, i32) {
    %c0_i32 = arith.constant 0 : i32
    %c0_i32_0 = arith.constant 0 : i32
    %c0_i32_1 = arith.constant 0 : i32
    return %c0_i32, %c0_i32_0 : i32, i32
  }
  func.func @transform_6(%arg0: i32) -> (i32, i32) {
    %c0_i32 = arith.constant 0 : i32
    %c0_i32_0 = arith.constant 0 : i32
    return %arg0, %c0_i32 : i32, i32
  }
}

</mosaic_0001>

<bundles_post_ra>
// kernel: cnn_forward.1
= control target key start
LH: loop header
LB: loop body
LE: loop exit
PB: predicated region body
PF: predicated region fallthrough
CT: control target
= control target key end

     0   :  { %11 = vsyncpa [#allocation3], 0  ;;  %s2172_s0 = inlined_call_operand.vmem [shape: s32[256,1], index: 0, kind: input, shape index: {}]   ;;  %s2173_s1 = inlined_call_operand.vmem [shape: bf16[24,32], index: 1, kind: input, shape index: {}]   ;;  %s2174_s2 = inlined_call_operand.vmem [shape: bf16[96,32], index: 2, kind: input, shape index: {}]   ;;  %s2175_s3 = inlined_call_operand.vmem [shape: f32[1,32], index: 3, kind: input, shape index: {}]   ;;  %s2176_s4 = inlined_call_operand.vmem [shape: bf16[96,128], index: 4, kind: input, shape index: {}]   ;;  %s2177_s5 = inlined_call_operand.vmem [shape: f32[1,128], index: 5, kind: input, shape index: {}]   ;;  %s2178_s6 = inlined_call_operand.hbm [shape: f32[16,128], index: 6, kind: output, shape index: {}]  }
   0x1   :  { %13 = vsyncpa [#allocation3 + $0x1], 0  ;;  %s1725_s21 = smov 0   ;;  %s1727_s22 = smov 0  }
   0x2   :  { %s1729_s23 = smov 0   ;;  %s1731_s24 = smov 0  }
   0x3 LB: > { %s1746_s25 = sadd.s32 4294967295, %s1683_s24   ;;  %s1377_s26 = sadd.s32 4294967294, %s1683_s24   ;;  %s1683_s24 = sphi %s1731_s24, %s2184_s24   ;;  %s1679_s23 = sphi %s1729_s23, %s2183_s23   ;;  %s1675_s22 = sphi %s1727_s22, %s2182_s22   ;;  %s1671_s21 = sphi %s1725_s21, %s2181_s21  }
   0x4   : > { %s1750_s27 = sadd.s32 1, %s1683_s24   ;;  %s157_s28 = sadd.s32 1, %s1679_s23 }
   0x5   : > { %s154_s29 = ssub.s32 %s1683_s24, %s1750_s27  ;;  %p167_p0 = scmp.ne.s32.totalorder %s1679_s23, %s1675_s22 }
   0x6   : > { %p155_p1 = scmp.eq.s32.totalorder %s154_s29, 0  ;;  %p168_p2 = scmp.eq.s32.totalorder %s1746_s25, 1 }
   0x7   : > { %p173_p3 = scmp.ne.s32.totalorder %s1675_s22, %s1671_s21  ;;  %p174_p4 = scmp.eq.s32.totalorder %s1377_s26, 1 }
   0x8   : > { %s1761_s30 = scalar_select %p155_p1, %s1679_s23, %s157_s28  }
   0x9   : > { %p1763_p5 = por %p168_p2, %p167_p0  ;;  %p1767_p6 = por %p174_p4, %p173_p3 }
   0xa   : > { %p1380_p7 = scmp.ge.s32.totalorder %s1683_s24, 1  ;;  %p216_p8 = scmp.lt.s32.totalorder %s1683_s24, 3 }
   0xc   : > { %p217_p9 = pnand %p1380_p7, %p216_p8 }
   0xd   : > { %s1382_s9 = sshll.u32 (!%p217_p9), %s1746_s25, 4  ;;  %s1688_s16 = smov (!%p217_p9), 64  }
   0xe   : > { %220 = sbr.rel (%p217_p9) target bundleno = 1085 (0x43d), region = 44  ;;  %p247_p10 = scmp.lt.s32.totalorder (!%p217_p9), %s1382_s9, 31 }
   0xf   : > { %s243_s18 = sand.u32 (!%p217_p9), 1, %s1675_s22   ;;  %s1441_s20 = sshll.u32 (!%p217_p9), %s1746_s25, 7 }
  0x10   : > { %s1381_s19 = sshll.u32 (!%p217_p9), %s243_s18, 3  ;;  %s2135_s10 = scalar_lea.hbm (!%p217_p9), %s2178_s6, %s1441_s20 }
  0x11   : > { %s245_s26 = scalar_lea.vmem (!%p217_p9), [#allocation2], %s1381_s19  ;;  %s1305_s11 = scalar_lea.sflag (!%p217_p9), [#allocation3], %s243_s18 }
  0x12   : > { %s1318_s28 = sshll.u32 (!%p217_p9), %s245_s26, 4  ;;  %s1689_s25 = smov (!%p217_p9), [#allocation2]   ;;  %s1319_s28 = int_to_ptr.vmem [resolvable:$true] %s1318_s28 }
  0x13   : > { %v1685_v0 = vmov 0   ;;  %s2186_s9 = smov (!%p247_p10, %s1382_s9), 31  ;;  %v1609_v1 = vld [vmem:[%s2173_s1 + $0x8] ss:$0 sps:$4 sm:$0xff]   ;;  %vm412_vm0 = vcmask 1043456   ;;  %v1610_v9 = vld [vmem:[%s2173_s1] sm:$0xff]   ;;  %v269_v20 = vlaneseq }
  0x14   : > { %1608 = vset.pattern.permute.xlu1 %v1685_v0  ;;  %1607 = vset.pattern.permute.xlu0 %v1685_v0  ;;  %s1383_s12 = sshll.u32 %s2186_s9, 3  ;;  %v414_v2 = vsel %vm412_vm0, %v1609_v1, 0  ;;  %vm387_vm5 = vcmask 195584   ;;  %v1686_v26 = vmov 0.0   ;;  %v1611_v63 = vld [vmem:[%s2174_s2 + $0x28] sm:$0xff]   ;;  %v1612_v0 = vld [vmem:[%s2174_s2 + $0x20] sm:$0xff]  }
  0x15   : > { %1562 = vmatprep.subr.msk.bf16.mxu0 %vm412_vm0, %v1609_v1  ;;  %1563 = vmatprep.subr.msk.bf16.mxu1 %vm412_vm0, %v1609_v1  ;;  %s1783_s15 = scalar_lea.vmem %s2172_s0, %s1383_s12  ;;  %v1805_v21 = vand.u32 127, %v269_v20  ;;  %v1613_v1 = vld [vmem:[%s2174_s2 + $0x18] sm:$0xff]   ;;  %s1623_s12 = scalar_lea.vmem %s1319_s28, 128 }
  0x16   : > { %1483 = vmatpush3.bf16.msra.mxu0 %v414_v2  ;;  %1560 = vmatpush3.bf16.msra.mxu1 %v414_v2  ;;  %v255_v3 = vld [vmem:[%s1783_s15 + $0x10] sm:$0xff]  ;;  %v253_v4 = vld [vmem:[%s1783_s15] sm:$0xff]  ;;  %v256_v5 = vld [vmem:[%s1783_s15 + $0x18] sm:$0xff]  ;;  %p1624_p11 = scmp.ne.s32.totalorder %s1319_s28, %s1623_s12  ;;  %s1627_s13 = sshll.u32 %s1689_s25, 4  ;;  %s1628_s13 = int_to_ptr.vmem [resolvable:$false] %s1627_s13 }
  0x17   : > { %278 = vperm.xlu1 %1608, %v255_v3   ;;  %272 = vperm.xlu0 %1607, %v253_v4   ;;  %v254_v6 = vld [vmem:[%s1783_s15 + $0x8] sm:$0xff]  ;;  %v257_v8 = vld [vmem:[%s1783_s15 + $0x20] sm:$0xff]  ;;  %v260_v10 = vld [vmem:[%s1783_s15 + $0x38] sm:$0xff]  ;;  %s1629_s14 = scalar_lea.vmem %s1628_s13, 256  ;;  %p1630_p0 = scmp.lt.s32.totalorder %s1319_s28, %s1628_s13 }
  0x18   : > { %v258_v7 = vld [vmem:[%s1783_s15 + $0x28] sm:$0xff]  ;;  %1484 = vmatprep.subr.bf16.mxu0 %v1610_v9  ;;  %1559 = vmatprep.subr.bf16.mxu1 %v1610_v9  ;;  %v259_v11 = vld [vmem:[%s1783_s15 + $0x30] sm:$0xff]  ;;  %v261_v13 = vld [vmem:[%s1783_s15 + $0x40] sm:$0xff]  ;;  %p1625_p12 = pnand %p1624_p11, %p1763_p5  ;;  %p1631_p1 = scmp.lt.s32.totalorder %s1629_s14, %s1623_s12 }
  0x19   : > { %v262_v12 = vld [vmem:[%s1783_s15 + $0x48] sm:$0xff]  ;;  %v264_v14 = vld [vmem:[%s1783_s15 + $0x58] sm:$0xff]  ;;  %v263_v15 = vld [vmem:[%s1783_s15 + $0x50] sm:$0xff] }
  0x1a   : > { %1485 = vmatpush3.bf16.msra.mxu0 %v1610_v9  ;;  %1561 = vmatpush3.bf16.msra.mxu1 %v1610_v9  ;;  %v266_v16 = vld [vmem:[%s1783_s15 + $0x68] sm:$0xff]  ;;  %v265_v17 = vld [vmem:[%s1783_s15 + $0x60] sm:$0xff]  ;;  %v268_v18 = vld [vmem:[%s1783_s15 + $0x78] sm:$0xff]  ;;  %p1626_p13 = pneg %p1625_p12  ;;  %p1632_p2 = por %p1631_p1, %p1630_p0 }
  0x1b   : > { %281 = vperm.xlu1 %1608, %v256_v5   ;;  %275 = vperm.xlu0 %1607, %v254_v6   ;;  %v267_v19 = vld [vmem:[%s1783_s15 + $0x70] sm:$0xff]  ;;  %v1615_v5 = vld [vmem:[%s2174_s2 + $0x8] sm:$0xff]   ;;  %s1687_s15 = smov 32  }
  0x1c   : > { %1502 = vmatprep.subr.bf16.mxu1 %v1611_v63  ;;  %v1614_v2 = vld [vmem:[%s2174_s2 + $0x10] sm:$0xff]   ;;  %p1633_p3 = pnand %p1632_p2, %p1626_p13 }
  0x1f   : > { %287 = vperm.xlu1 %1608, %v258_v7   ;;  %284 = vperm.xlu0 %1607, %v257_v8  }
  0x23   : > { %293 = vperm.xlu1 %1608, %v260_v10   ;;  %290 = vperm.xlu0 %1607, %v259_v11  }
  0x27   : > { %299 = vperm.xlu1 %1608, %v262_v12   ;;  %296 = vperm.xlu0 %1607, %v261_v13   ;;  %v1616_v13 = vld [vmem:[%s2174_s2] sm:$0xff]  }
  0x2b   : > { %305 = vperm.xlu1 %1608, %v264_v14   ;;  %302 = vperm.xlu0 %1607, %v263_v15  }
  0x2f   : > { %311 = vperm.xlu1 %1608, %v266_v16   ;;  %308 = vperm.xlu0 %1607, %v265_v17  }
  0x33   : > { %317 = vperm.xlu1 %1608, %v268_v18   ;;  %314 = vperm.xlu0 %1607, %v267_v19  }
  0x92   : > { %v279_v22 = vpop.permute.xlu1 %278  ;;  %v273_v23 = vpop.permute.xlu0 %272 }
  0x93   : > { %vm321_vm1 = vcmp.eq.s32.totalorder %v279_v22, %v1805_v21  ;;  %vm319_vm2 = vcmp.eq.s32.totalorder %v273_v23, %v1805_v21 }
  0x94   : > { %v1386_v27 = vsel %vm321_vm1, 1.0, %v1686_v26  ;;  %v1384_v28 = vsel %vm319_vm2, 1.0, %v1686_v26 }
  0x96   : > { %v282_v24 = vpop.permute.xlu1 %281  ;;  %v276_v25 = vpop.permute.xlu0 %275 }
  0x97   : > { %vm322_vm3 = vcmp.eq.s32.totalorder %v282_v24, %v1805_v21  ;;  %vm320_vm4 = vcmp.eq.s32.totalorder %v276_v25, %v1805_v21 }
  0x98   : > { %v1387_v29 = vsel %vm322_vm3, 1.0, %v1686_v26  ;;  %v1385_v30 = vsel %vm320_vm4, 1.0, %v1686_v26  ;;  %vm521_vm3 = vsmask.f32 7424  ;;  %vm609_vm4 = vcmask 1046528  }
  0x99   : > { %v368_v31 = vpack.c.bf16 %v1387_v29, %v1386_v27  ;;  %v367_v32 = vpack.c.bf16 %v1385_v30, %v1384_v28 }
  0x9a   : > { %v288_v33 = vpop.permute.xlu1 %287  ;;  %v285_v34 = vpop.permute.xlu0 %284 }
  0x9b   : > { %vm324_vm6 = vcmp.eq.s32.totalorder %v288_v33, %v1805_v21  ;;  %vm323_vm7 = vcmp.eq.s32.totalorder %v285_v34, %v1805_v21  ;;  %1486 = vmatprep.mubr.msk.bf16.mxu0 %vm387_vm5, %v367_v32 }
  0x9c   : > { %v1389_v35 = vsel %vm324_vm6, 1.0, %v1686_v26  ;;  %v1388_v36 = vsel %vm323_vm7, 1.0, %v1686_v26  ;;  %1487 = vmatmul.mubr.msk.bf16.vlgmr.msra.gmra.mxu0 %vm387_vm5, %v368_v31  ;;  %vm658_vm6 = vcmask 523264   ;;  %vm730_vm7 = vcmask 785408  }
  0x9d   : > { %v369_v37 = vpack.c.bf16 %v1389_v35, %v1388_v36 }
  0x9e   : > { %v294_v38 = vpop.permute.xlu1 %293  ;;  %v291_v39 = vpop.permute.xlu0 %290 }
  0x9f   : > { %vm326_vm8 = vcmp.eq.s32.totalorder %v294_v38, %v1805_v21  ;;  %vm325_vm9 = vcmp.eq.s32.totalorder %v291_v39, %v1805_v21  ;;  %1490 = vmatprep.mubr.msk.bf16.mxu0 %vm387_vm5, %v369_v37 }
  0xa0   : > { %v1391_v40 = vsel %vm326_vm8, 1.0, %v1686_v26  ;;  %v1390_v41 = vsel %vm325_vm9, 1.0, %v1686_v26  ;;  %vm1288_vm9 = vcmask 1041409  }
  0xa1   : > { %v370_v42 = vpack.c.bf16 %v1391_v40, %v1390_v41 }
  0xa2   : > { %v300_v43 = vpop.permute.xlu1 %299  ;;  %v297_v44 = vpop.permute.xlu0 %296 }
  0xa3   : > { %vm328_vm10 = vcmp.eq.s32.totalorder %v300_v43, %v1805_v21  ;;  %vm327_vm11 = vcmp.eq.s32.totalorder %v297_v44, %v1805_v21 }
  0xa4   : > { %v1393_v45 = vsel %vm328_vm10, 1.0, %v1686_v26  ;;  %v1392_v46 = vsel %vm327_vm11, 1.0, %v1686_v26  ;;  %1491 = vmatmul.mubr.msk.bf16.gmra.mxu0 %vm387_vm5, %v370_v42  ;;  %vm1292_vm10 = vcmask 1043459   ;;  %vm1294_vm11 = vcmask 1044484  }
  0xa5   : > { %v371_v47 = vpack.c.bf16 %v1393_v45, %v1392_v46 }
  0xa6   : > { %v306_v48 = vpop.permute.xlu1 %305  ;;  %v303_v49 = vpop.permute.xlu0 %302 }
  0xa7   : > { %vm330_vm12 = vcmp.eq.s32.totalorder %v306_v48, %v1805_v21  ;;  %vm329_vm13 = vcmp.eq.s32.totalorder %v303_v49, %v1805_v21  ;;  %1494 = vmatprep.mubr.msk.bf16.mxu0 %vm387_vm5, %v371_v47 }
  0xa8   : > { %v1395_v50 = vsel %vm330_vm12, 1.0, %v1686_v26  ;;  %v1394_v51 = vsel %vm329_vm13, 1.0, %v1686_v26  ;;  %vm1296_vm12 = vcmask 1045509   ;;  %vm1298_vm13 = vcmask 1046534  }
  0xa9   : > { %v372_v52 = vpack.c.bf16 %v1395_v50, %v1394_v51 }
  0xaa   : > { %v312_v53 = vpop.permute.xlu1 %311  ;;  %v309_v54 = vpop.permute.xlu0 %308 }
  0xab   : > { %vm332_vm14 = vcmp.eq.s32.totalorder %v312_v53, %v1805_v21  ;;  %vm331_vm15 = vcmp.eq.s32.totalorder %v309_v54, %v1805_v21 }
  0xac   : > { %v1397_v55 = vsel %vm332_vm14, 1.0, %v1686_v26  ;;  %v1396_v56 = vsel %vm331_vm15, 1.0, %v1686_v26  ;;  %1495 = vmatmul.mubr.msk.bf16.gmra.mxu0 %vm387_vm5, %v372_v52  ;;  %vm1300_vm14 = vcmask 1047559  }
  0xad   : > { %v373_v57 = vpack.c.bf16 %v1397_v55, %v1396_v56 }
  0xae   : > { %v318_v58 = vpop.permute.xlu1 %317  ;;  %v315_v59 = vpop.permute.xlu0 %314 }
  0xaf   : > { %vm334_vm1 = vcmp.eq.s32.totalorder %v318_v58, %v1805_v21  ;;  %vm333_vm2 = vcmp.eq.s32.totalorder %v315_v59, %v1805_v21  ;;  %1498 = vmatprep.mubr.msk.bf16.mxu1 %vm387_vm5, %v373_v57 }
  0xb0   : > { %v1399_v60 = vsel %vm334_vm1, 1.0, %v1686_v26  ;;  %v1398_v61 = vsel %vm333_vm2, 1.0, %v1686_v26 }
  0xb1   : > { %v374_v62 = vpack.c.bf16 %v1399_v60, %v1398_v61 }
  0xb3   : > { %1499 = vmatmul.mubr.msk.bf16.vlgmr.msra.gmra.mxu1 %vm387_vm5, %v374_v62  ;;  %vm641_vm5 = vcmask 261120  }
  0xb4   : > { %1503 = vmatpush3.bf16.msra.mxu1 %v1611_v63 }
  0xb5   : > { %1504 = vmatprep.subr.bf16.mxu1 %v1612_v0 }
  0xb8   : > { %1505 = vmatpush3.bf16.msra.mxu1 %v1612_v0 }
  0xb9   : > { %1506 = vmatprep.subr.bf16.mxu1 %v1613_v1 }
  0xbc   : > { %1507 = vmatpush3.bf16.msra.mxu1 %v1613_v1 }
  0xbd   : > { %1508 = vmatprep.subr.bf16.mxu1 %v1614_v2 }
  0xc0   : > { %1509 = vmatpush3.bf16.msra.mxu1 %v1614_v2 }
  0xc1   : > { %1510 = vmatprep.subr.bf16.mxu1 %v1615_v5 }
  0xc4   : > { %1511 = vmatpush3.bf16.msra.mxu1 %v1615_v5 }
  0xc5   : > { %1512 = vmatprep.subr.bf16.mxu1 %v1616_v13 }
  0xc8   : > { %1513 = vmatpush3.bf16.msra.mxu1 %v1616_v13 }
 0x15c   : > { %v1488_v3 = vpop.f32.mrf.mxu0 }
 0x15e   : > { %v450_v4 = vpop.f32.mrf.mxu0 }
 0x160   : > { %v1489_v6 = vpop.f32.mrf.mxu0 }
 0x161   : > { %v1846_v7 = vpack.c.bf16 %v1489_v6, %v1488_v3 }
 0x162   : > { %v453_v8 = vpop.f32.mrf.mxu0 }
 0x163   : > { %v1848_v9 = vpack.c.bf16 %v453_v8, %v450_v4  ;;  %v530_v12 = vshll.u32 %v1846_v7, 16  ;;  %v611_v28 = vrot.slane %v1846_v7, 1  ;;  %v534_v29 = vshrl.u32 %v1846_v7, 16 }
 0x164   : > { %v1492_v10 = vpop.f32.mrf.mxu0 }
 0x165   : > { %v525_v11 = vshll.u32 %v1848_v9, 16  ;;  %v523_v15 = vshrl.u32 %v1848_v9, 16  ;;  %v532_v21 = vrot.slane %v530_v12, 1  ;;  %v610_v25 = vrot.slane %v1848_v9, 1 }
 0x166   : > { %v466_v14 = vpop.f32.mrf.mxu0 }
 0x167   : > { %v527_v16 = vrot.slane %v525_v11, 1  ;;  %v612_v32 = vsel %vm609_vm4, %v610_v25, %v611_v28  ;;  %v536_v33 = vor.u32 %v534_v29, %v532_v21 }
 0x168   : > { %v1493_v17 = vpop.f32.mrf.mxu0 }
 0x169   : > { %v1856_v18 = vpack.c.bf16 %v1493_v17, %v1492_v10  ;;  %v528_v19 = vor.u32 %v527_v16, %v523_v15 }
 0x16a   : > { %v469_v22 = vpop.f32.mrf.mxu0 }
 0x16b   : > { %v1858_v23 = vpack.c.bf16 %v469_v22, %v466_v14  ;;  %v533_v24 = vsel %vm521_vm3, %v528_v19, %v532_v21  ;;  %v546_v27 = vshll.u32 %v1856_v18, 16  ;;  %v615_v46 = vrot.slane %v1856_v18, 1 }
 0x16c   : > { %585 = vrot.lane.b32.xlu0 %v533_v24, %s1687_s15  ;;  %v1496_v26 = vpop.f32.mrf.mxu0  ;;  %v550_v49 = vshrl.u32 %v1856_v18, 16 }
 0x16d   : > { %v538_v30 = vshll.u32 %v1858_v23, 16  ;;  %v542_v35 = vshrl.u32 %v1858_v23, 16  ;;  %v548_v37 = vrot.slane %v546_v27, 1  ;;  %v613_v41 = vrot.slane %v1858_v23, 1 }
 0x16e   : > { %v482_v31 = vpop.f32.mrf.mxu0 }
 0x16f   : > { %v540_v34 = vrot.slane %v538_v30, 1  ;;  %v614_v48 = vsel %vm609_vm4, %v611_v28, %v613_v41  ;;  %v616_v53 = vsel %vm609_vm4, %v613_v41, %v615_v46  ;;  %v552_v54 = vor.u32 %v550_v49, %v548_v37 }
 0x170   : > { %625 = vrot.lane.b32.xlu0 %v612_v32, %s1688_s16  ;;  %v1497_v36 = vpop.f32.mrf.mxu0 }
 0x171   : > { %v1870_v38 = vpack.c.bf16 %v1497_v36, %v1496_v26  ;;  %v541_v39 = vsel %vm521_vm3, %v536_v33, %v540_v34  ;;  %v544_v40 = vor.u32 %v542_v35, %v540_v34 }
 0x172   : > { %587 = vrot.lane.b32.xlu1 %v541_v39, %s1687_s15  ;;  %v485_v42 = vpop.f32.mrf.mxu0 }
 0x173   : > { %v1875_v43 = vpack.c.bf16 %v485_v42, %v482_v31  ;;  %v1500_v44 = vpop.f32.mrf.mxu1  ;;  %v549_v45 = vsel %vm521_vm3, %v544_v40, %v548_v37  ;;  %v562_v51 = vshll.u32 %v1870_v38, 16  ;;  %v566_v1 = vshrl.u32 %v1870_v38, 16 }
 0x174   : > { %589 = vrot.lane.b32.xlu0 %v549_v45, %s1687_s15  ;;  %v619_v5 = vrot.slane %v1870_v38, 1 }
 0x175   : > { %v498_v47 = vpop.f32.mrf.mxu1  ;;  %v554_v50 = vshll.u32 %v1875_v43, 16  ;;  %v558_v56 = vshrl.u32 %v1875_v43, 16  ;;  %v564_v61 = vrot.slane %v562_v51, 1  ;;  %v617_v62 = vrot.slane %v1875_v43, 1 }
 0x176   : > { %627 = vrot.lane.b32.xlu1 %v614_v48, %s1688_s16 }
 0x177   : > { %v1501_v52 = vpop.f32.mrf.mxu1  ;;  %v556_v55 = vrot.slane %v554_v50, 1  ;;  %v618_v4 = vsel %vm609_vm4, %v615_v46, %v617_v62  ;;  %v568_v6 = vor.u32 %v566_v1, %v564_v61  ;;  %v620_v11 = vsel %vm609_vm4, %v617_v62, %v619_v5 }
 0x178   : > { %v1887_v57 = vpack.c.bf16 %v1501_v52, %v1500_v44  ;;  %629 = vrot.lane.b32.xlu0 %v616_v53, %s1688_s16  ;;  %v1617_v53 = vld [vmem:[%s2176_s4 + $0x28] sm:$0xff]  }
 0x179   : > { %v501_v58 = vpop.f32.mrf.mxu1  ;;  %v557_v59 = vsel %vm521_vm3, %v552_v54, %v556_v55  ;;  %v560_v60 = vor.u32 %v558_v56, %v556_v55  ;;  %v1618_v54 = vld [vmem:[%s2176_s4 + $0x20] sm:$0xff]   ;;  %1530 = vmatprep.subr.bf16.mxu0 %v1617_v53  ;;  %v1619_v55 = vld [vmem:[%s2176_s4 + $0x18] sm:$0xff]   ;;  %v1620_v56 = vld [vmem:[%s2176_s4 + $0x10] sm:$0xff]  }
 0x17a   : > { %v1892_v63 = vpack.c.bf16 %v501_v58, %v498_v47  ;;  %591 = vrot.lane.b32.xlu1 %v557_v59, %s1687_s15  ;;  %v578_v3 = vshll.u32 %v1887_v57, 16  ;;  %v623_v19 = vrot.slane %v1887_v57, 1  ;;  %v582_v21 = vshrl.u32 %v1887_v57, 16  ;;  %1531 = vmatpush3.bf16.msra.mxu0 %v1617_v53  ;;  %v1966_v58 = vld [vmem:[%s2175_s3] ss:$0 sm:$0xff] }
 0x17b   : > { %v565_v0 = vsel %vm521_vm3, %v560_v60, %v564_v61  ;;  %1532 = vmatprep.subr.bf16.mxu0 %v1618_v54 }
 0x17c   : > { %593 = vrot.lane.b32.xlu0 %v565_v0, %s1687_s15  ;;  %v570_v2 = vshll.u32 %v1892_v63, 16  ;;  %v574_v10 = vshrl.u32 %v1892_v63, 16  ;;  %v580_v14 = vrot.slane %v578_v3, 1  ;;  %v621_v15 = vrot.slane %v1892_v63, 1 }
 0x17e   : > { %631 = vrot.lane.b32.xlu1 %v618_v4, %s1688_s16  ;;  %v572_v8 = vrot.slane %v570_v2, 1  ;;  %v622_v17 = vsel %vm609_vm4, %v619_v5, %v621_v15  ;;  %v624_v22 = vsel %vm609_vm4, %v621_v15, %v623_v19  ;;  %v584_v24 = vor.u32 %v582_v21, %v580_v14  ;;  %1533 = vmatpush3.bf16.msra.mxu0 %v1618_v54  ;;  %v1621_v4 = vld [vmem:[%s2176_s4 + $0x8] sm:$0xff]   ;;  %v1622_v21 = vld [vmem:[%s2176_s4] sm:$0xff]  }
 0x17f   : > { %1534 = vmatprep.subr.bf16.mxu0 %v1619_v55 }
 0x180   : > { %633 = vrot.lane.b32.xlu0 %v620_v11, %s1688_s16  ;;  %v573_v12 = vsel %vm521_vm3, %v568_v6, %v572_v8  ;;  %v576_v13 = vor.u32 %v574_v10, %v572_v8 }
 0x182   : > { %595 = vrot.lane.b32.xlu1 %v573_v12, %s1687_s15  ;;  %v581_v16 = vsel %vm521_vm3, %v576_v13, %v580_v14  ;;  %1535 = vmatpush3.bf16.msra.mxu0 %v1619_v55 }
 0x183   : > { %1536 = vmatprep.subr.bf16.mxu0 %v1620_v56 }
 0x184   : > { %597 = vrot.lane.b32.xlu0 %v581_v16, %s1687_s15 }
 0x186   : > { %635 = vrot.lane.b32.xlu1 %v622_v17, %s1688_s16  ;;  %1537 = vmatpush3.bf16.msra.mxu0 %v1620_v56 }
 0x187   : > { %1538 = vmatprep.subr.bf16.mxu0 %v1621_v4 }
 0x188   : > { %637 = vrot.lane.b32.xlu0 %v624_v22, %s1688_s16 }
 0x18a   : > { %599 = vrot.lane.b32.xlu1 %v584_v24, %s1687_s15  ;;  %1539 = vmatpush3.bf16.msra.mxu0 %v1621_v4 }
 0x18b   : > { %1540 = vmatprep.subr.bf16.mxu0 %v1622_v21 }
 0x18e   : > { %639 = vrot.lane.b32.xlu1 %v623_v19, %s1688_s16  ;;  %1541 = vmatpush3.bf16.msra.mxu0 %v1622_v21 }
 0x1de   : > { %v586_v25 = vpop.permute.xlu0 %585 }
 0x1df   : > { %v643_v26 = vsel %vm641_vm5, %v1848_v9, %v586_v25 }
 0x1e2   : > { %v626_v27 = vpop.permute.xlu0 %625 }
 0x1e3   : > { %v660_v28 = vsel %vm658_vm6, %v643_v26, %v626_v27 }
 0x1e4   : > { %v588_v29 = vpop.permute.xlu1 %587  ;;  %1514 = vmatprep.mubr.msk.bf16.mxu1 %vm730_vm7, %v660_v28 }
 0x1e5   : > { %v645_v31 = vsel %vm641_vm5, %v1846_v7, %v588_v29 }
 0x1e6   : > { %v590_v30 = vpop.permute.xlu0 %589 }
 0x1e7   : > { %v647_v34 = vsel %vm641_vm5, %v1858_v23, %v590_v30 }
 0x1e8   : > { %v628_v32 = vpop.permute.xlu1 %627 }
 0x1e9   : > { %v662_v33 = vsel %vm658_vm6, %v645_v31, %v628_v32 }
 0x1ea   : > { %1515 = vmatmul.mubr.msk.bf16.vlgmr.msra.gmra.mxu1 %vm730_vm7, %v662_v33  ;;  %v630_v35 = vpop.permute.xlu0 %629 }
 0x1eb   : > { %v664_v9 = vsel %vm658_vm6, %v647_v34, %v630_v35 }
 0x1ec   : > { %v592_v36 = vpop.permute.xlu1 %591  ;;  %1518 = vmatprep.mubr.msk.bf16.mxu1 %vm730_vm7, %v664_v9 }
 0x1ed   : > { %v649_v39 = vsel %vm641_vm5, %v1856_v18, %v592_v36 }
 0x1ee   : > { %v594_v37 = vpop.permute.xlu0 %593 }
 0x1ef   : > { %v651_v41 = vsel %vm641_vm5, %v1875_v43, %v594_v37 }
 0x1f0   : > { %v632_v40 = vpop.permute.xlu1 %631 }
 0x1f1   : > { %v666_v7 = vsel %vm658_vm6, %v649_v39, %v632_v40 }
 0x1f2   : > { %1519 = vmatmul.mubr.msk.bf16.gmra.mxu1 %vm730_vm7, %v666_v7  ;;  %v634_v23 = vpop.permute.xlu0 %633 }
 0x1f3   : > { %v668_v42 = vsel %vm658_vm6, %v651_v41, %v634_v23 }
 0x1f4   : > { %v596_v44 = vpop.permute.xlu1 %595  ;;  %1522 = vmatprep.mubr.msk.bf16.mxu1 %vm730_vm7, %v668_v42 }
 0x1f5   : > { %v653_v46 = vsel %vm641_vm5, %v1870_v38, %v596_v44 }
 0x1f6   : > { %v598_v45 = vpop.permute.xlu0 %597 }
 0x1f7   : > { %v655_v48 = vsel %vm641_vm5, %v1892_v63, %v598_v45 }
 0x1f8   : > { %v636_v47 = vpop.permute.xlu1 %635 }
 0x1f9   : > { %v670_v18 = vsel %vm658_vm6, %v653_v46, %v636_v47 }
 0x1fa   : > { %1523 = vmatmul.mubr.msk.bf16.gmra.mxu1 %vm730_vm7, %v670_v18  ;;  %v638_v43 = vpop.permute.xlu0 %637 }
 0x1fb   : > { %v672_v49 = vsel %vm658_vm6, %v655_v48, %v638_v43 }
 0x1fc   : > { %v600_v50 = vpop.permute.xlu1 %599  ;;  %1526 = vmatprep.mubr.msk.bf16.mxu1 %vm730_vm7, %v672_v49 }
 0x1fd   : > { %v657_v51 = vsel %vm641_vm5, %v1887_v57, %v600_v50 }
 0x200   : > { %v640_v52 = vpop.permute.xlu1 %639 }
 0x201   : > { %v674_v38 = vsel %vm658_vm6, %v657_v51, %v640_v52 }
 0x202   : > { %1527 = vmatmul.mubr.msk.bf16.gmra.mxu1 %vm730_vm7, %v674_v38 }
 0x2aa   : > { %v1516_v57 = vpop.f32.mrf.mxu1 }
 0x2ab   : > { %v790_v60 = vadd.f32 %v1516_v57, %v1966_v58 }
 0x2ac   : > { %v781_v59 = vpop.f32.mrf.mxu1 }
 0x2ad   : > { %v782_v62 = vadd.f32 %v1966_v58, %v781_v59  ;;  %v846_v1 = vmax.f32 %v790_v60, 0.0 }
 0x2ae   : > { %v1517_v61 = vpop.f32.mrf.mxu1 }
 0x2af   : > { %v793_v63 = vadd.f32 %v1517_v61, %v1966_v58  ;;  %v844_v6 = vmax.f32 %v782_v62, 0.0 }
 0x2b0   : > { %v784_v0 = vpop.f32.mrf.mxu1 }
 0x2b1   : > { %v847_v2 = vmax.f32 %v793_v63, 0.0  ;;  %v785_v3 = vadd.f32 %v1966_v58, %v784_v0 }
 0x2b2   : > { %v1520_v5 = vpop.f32.mrf.mxu1 }
 0x2b3   : > { %v1975_v8 = vpack.c.bf16 %v847_v2, %v846_v1  ;;  %v845_v10 = vmax.f32 %v785_v3, 0.0  ;;  %v806_v13 = vadd.f32 %v1520_v5, %v1966_v58 }
 0x2b4   : > { %v797_v11 = vpop.f32.mrf.mxu1 }
 0x2b5   : > { %v1977_v12 = vpack.c.bf16 %v845_v10, %v844_v6  ;;  %v798_v15 = vadd.f32 %v1966_v58, %v797_v11  ;;  %v876_v19 = vshll.u32 %v1975_v8, 16  ;;  %v850_v28 = vmax.f32 %v806_v13, 0.0 }
 0x2b6   : > { %v1521_v14 = vpop.f32.mrf.mxu1  ;;  %v956_v41 = vrot.slane %v1975_v8, 1  ;;  %v880_v23 = vshrl.u32 %v1975_v8, 16 }
 0x2b7   : > { %v809_v16 = vadd.f32 %v1521_v14, %v1966_v58  ;;  %v871_v17 = vshll.u32 %v1977_v12, 16  ;;  %v869_v26 = vshrl.u32 %v1977_v12, 16  ;;  %v848_v30 = vmax.f32 %v798_v15, 0.0 }
 0x2b8   : > { %v800_v22 = vpop.f32.mrf.mxu1  ;;  %v878_v33 = vrot.slane %v876_v19, 1  ;;  %v955_v9 = vrot.slane %v1977_v12, 1 }
 0x2b9   : > { %v851_v24 = vmax.f32 %v809_v16, 0.0  ;;  %v801_v25 = vadd.f32 %v1966_v58, %v800_v22  ;;  %v873_v27 = vrot.slane %v871_v17, 1 }
 0x2ba   : > { %v1524_v29 = vpop.f32.mrf.mxu1  ;;  %v957_v46 = vsel %vm609_vm4, %v955_v9, %v956_v41  ;;  %v882_v47 = vor.u32 %v880_v23, %v878_v33 }
 0x2bb   : > { %v849_v31 = vmax.f32 %v801_v25, 0.0  ;;  %v874_v32 = vor.u32 %v873_v27, %v869_v26  ;;  %v1989_v34 = vpack.c.bf16 %v851_v24, %v850_v28  ;;  %v822_v37 = vadd.f32 %v1524_v29, %v1966_v58 }
 0x2bc   : > { %v813_v35 = vpop.f32.mrf.mxu1 }
 0x2bd   : > { %v1992_v36 = vpack.c.bf16 %v849_v31, %v848_v30  ;;  %v879_v39 = vsel %vm521_vm3, %v874_v32, %v878_v33  ;;  %v814_v40 = vadd.f32 %v1966_v58, %v813_v35  ;;  %v892_v18 = vshll.u32 %v1989_v34, 16 }
 0x2be   : > { %931 = vrot.lane.b32.xlu0 %v879_v39, %s1687_s15  ;;  %v1525_v7 = vpop.f32.mrf.mxu1  ;;  %v854_v48 = vmax.f32 %v822_v37, 0.0  ;;  %v896_v2 = vshrl.u32 %v1989_v34, 16  ;;  %v960_v13 = vrot.slane %v1989_v34, 1 }
 0x2bf   : > { %v825_v42 = vadd.f32 %v1525_v7, %v1966_v58  ;;  %v884_v44 = vshll.u32 %v1992_v36, 16  ;;  %v852_v51 = vmax.f32 %v814_v40, 0.0  ;;  %v888_v38 = vshrl.u32 %v1992_v36, 16 }
 0x2c0   : > { %v816_v45 = vpop.f32.mrf.mxu1  ;;  %v958_v56 = vrot.slane %v1992_v36, 1  ;;  %v894_v61 = vrot.slane %v892_v18, 1 }
 0x2c1   : > { %v855_v43 = vmax.f32 %v825_v42, 0.0  ;;  %v817_v49 = vadd.f32 %v1966_v58, %v816_v45  ;;  %v886_v50 = vrot.slane %v884_v44, 1 }
 0x2c2   : > { %970 = vrot.lane.b32.xlu0 %v957_v46, %s1688_s16  ;;  %v1528_v52 = vpop.f32.mrf.mxu1  ;;  %v959_v5 = vsel %vm609_vm4, %v956_v41, %v958_v56  ;;  %v898_v14 = vor.u32 %v896_v2, %v894_v61  ;;  %v961_v22 = vsel %vm609_vm4, %v958_v56, %v960_v13 }
 0x2c3   : > { %v2007_v53 = vpack.c.bf16 %v855_v43, %v854_v48  ;;  %v853_v54 = vmax.f32 %v817_v49, 0.0  ;;  %v887_v55 = vsel %vm521_vm3, %v882_v47, %v886_v50  ;;  %v838_v57 = vadd.f32 %v1528_v52, %v1966_v58 }
 0x2c4   : > { %933 = vrot.lane.b32.xlu1 %v887_v55, %s1687_s15  ;;  %v829_v59 = vpop.f32.mrf.mxu1  ;;  %v890_v60 = vor.u32 %v888_v38, %v886_v50 }
 0x2c5   : > { %v2013_v62 = vpack.c.bf16 %v853_v54, %v852_v51  ;;  %v830_v63 = vadd.f32 %v1966_v58, %v829_v59  ;;  %v908_v3 = vshll.u32 %v2007_v53, 16  ;;  %v858_v10 = vmax.f32 %v838_v57, 0.0 }
 0x2c6   : > { %v895_v0 = vsel %vm521_vm3, %v890_v60, %v894_v61  ;;  %v1529_v1 = vpop.f32.mrf.mxu1  ;;  %v912_v32 = vshrl.u32 %v2007_v53, 16  ;;  %v964_v9 = vrot.slane %v2007_v53, 1 }
 0x2c7   : > { %935 = vrot.lane.b32.xlu0 %v895_v0, %s1687_s15  ;;  %v841_v4 = vadd.f32 %v1529_v1, %v1966_v58  ;;  %v900_v6 = vshll.u32 %v2013_v62, 16  ;;  %v904_v19 = vshrl.u32 %v2013_v62, 16  ;;  %v856_v21 = vmax.f32 %v830_v63, 0.0 }
 0x2c8   : > { %972 = vrot.lane.b32.xlu1 %v959_v5, %s1688_s16  ;;  %v832_v11 = vpop.f32.mrf.mxu1  ;;  %v910_v24 = vrot.slane %v908_v3, 1  ;;  %v962_v25 = vrot.slane %v2013_v62, 1 }
 0x2c9   : > { %v859_v15 = vmax.f32 %v841_v4, 0.0  ;;  %v833_v16 = vadd.f32 %v1966_v58, %v832_v11  ;;  %v902_v17 = vrot.slane %v900_v6, 1 }
 0x2ca   : > { %v963_v31 = vsel %vm609_vm4, %v960_v13, %v962_v25  ;;  %v914_v37 = vor.u32 %v912_v32, %v910_v24  ;;  %v965_v7 = vsel %vm609_vm4, %v962_v25, %v964_v9 }
 0x2cb   : > { %v2029_v26 = vpack.c.bf16 %v859_v15, %v858_v10  ;;  %v857_v27 = vmax.f32 %v833_v16, 0.0  ;;  %974 = vrot.lane.b32.xlu0 %v961_v22, %s1688_s16  ;;  %v903_v28 = vsel %vm521_vm3, %v898_v14, %v902_v17  ;;  %v906_v29 = vor.u32 %v904_v19, %v902_v17 }
 0x2cc   : > { %937 = vrot.lane.b32.xlu1 %v903_v28, %s1687_s15 }
 0x2cd   : > { %v866_v58 = vpack.c.bf16 %v857_v27, %v856_v21  ;;  %v911_v30 = vsel %vm521_vm3, %v906_v29, %v910_v24  ;;  %v924_v35 = vshll.u32 %v2029_v26, 16  ;;  %v968_v47 = vrot.slane %v2029_v26, 1  ;;  %v2092_v24 = vld [vmem:[%s2177_s5] ss:$0 sm:$0xff] }
 0x2ce   : > { %v928_v18 = vshrl.u32 %v2029_v26, 16 }
 0x2cf   : > { %939 = vrot.lane.b32.xlu0 %v911_v30, %s1687_s15  ;;  %v916_v33 = vshll.u32 %v866_v58, 16  ;;  %v920_v40 = vshrl.u32 %v866_v58, 16  ;;  %v926_v42 = vrot.slane %v924_v35, 1  ;;  %v966_v44 = vrot.slane %v866_v58, 1 }
 0x2d0   : > { %976 = vrot.lane.b32.xlu1 %v963_v31, %s1688_s16 }
 0x2d1   : > { %v918_v39 = vrot.slane %v916_v33, 1  ;;  %v967_v46 = vsel %vm609_vm4, %v964_v9, %v966_v44  ;;  %v969_v48 = vsel %vm609_vm4, %v966_v44, %v968_v47  ;;  %v930_v43 = vor.u32 %v928_v18, %v926_v42 }
 0x2d3   : > { %978 = vrot.lane.b32.xlu0 %v965_v7, %s1688_s16  ;;  %v919_v41 = vsel %vm521_vm3, %v914_v37, %v918_v39  ;;  %v922_v23 = vor.u32 %v920_v40, %v918_v39 }
 0x2d4   : > { %941 = vrot.lane.b32.xlu1 %v919_v41, %s1687_s15 }
 0x2d5   : > { %v927_v45 = vsel %vm521_vm3, %v922_v23, %v926_v42 }
 0x2d7   : > { %943 = vrot.lane.b32.xlu0 %v927_v45, %s1687_s15 }
 0x2d8   : > { %980 = vrot.lane.b32.xlu1 %v967_v46, %s1688_s16 }
 0x2db   : > { %982 = vrot.lane.b32.xlu0 %v969_v48, %s1688_s16 }
 0x2dc   : > { %945 = vrot.lane.b32.xlu1 %v930_v43, %s1687_s15 }
 0x2e0   : > { %984 = vrot.lane.b32.xlu1 %v968_v47, %s1688_s16 }
 0x330   : > { %v932_v49 = vpop.permute.xlu0 %931 }
 0x331   : > { %v987_v50 = vsel %vm641_vm5, %v1977_v12, %v932_v49 }
 0x334   : > { %v971_v51 = vpop.permute.xlu0 %970 }
 0x335   : > { %v1003_v52 = vsel %vm658_vm6, %v987_v50, %v971_v51 }
 0x336   : > { %v934_v38 = vpop.permute.xlu1 %933  ;;  %1542 = vmatprep.mubr.msk.bf16.mxu0 %vm730_vm7, %v1003_v52 }
 0x337   : > { %v989_v55 = vsel %vm641_vm5, %v1975_v8, %v934_v38 }
 0x339   : > { %v936_v54 = vpop.permute.xlu0 %935 }
 0x33a   : > { %v973_v56 = vpop.permute.xlu1 %972  ;;  %v991_v59 = vsel %vm641_vm5, %v1992_v36, %v936_v54 }
 0x33b   : > { %v1005_v57 = vsel %vm658_vm6, %v989_v55, %v973_v56 }
 0x33c   : > { %1543 = vmatmul.mubr.msk.bf16.vlgmr.msra.gmra.mxu0 %vm730_vm7, %v1005_v57 }
 0x33d   : > { %v975_v60 = vpop.permute.xlu0 %974 }
 0x33e   : > { %v1007_v12 = vsel %vm658_vm6, %v991_v59, %v975_v60  ;;  %v938_v61 = vpop.permute.xlu1 %937 }
 0x33f   : > { %1546 = vmatprep.mubr.msk.bf16.mxu0 %vm730_vm7, %v1007_v12  ;;  %v993_v0 = vsel %vm641_vm5, %v1989_v34, %v938_v61 }
 0x341   : > { %v940_v63 = vpop.permute.xlu0 %939 }
 0x342   : > { %v977_v1 = vpop.permute.xlu1 %976  ;;  %v995_v2 = vsel %vm641_vm5, %v2013_v62, %v940_v63 }
 0x343   : > { %v1009_v8 = vsel %vm658_vm6, %v993_v0, %v977_v1 }
 0x344   : > { %1547 = vmatmul.mubr.msk.bf16.gmra.mxu0 %vm730_vm7, %v1009_v8 }
 0x345   : > { %v979_v3 = vpop.permute.xlu0 %978 }
 0x346   : > { %v1011_v36 = vsel %vm658_vm6, %v995_v2, %v979_v3  ;;  %v942_v4 = vpop.permute.xlu1 %941 }
 0x347   : > { %1550 = vmatprep.mubr.msk.bf16.mxu0 %vm730_vm7, %v1011_v36  ;;  %v997_v6 = vsel %vm641_vm5, %v2007_v53, %v942_v4  ;;  %v1204_v53 = vshrl.u32 %v269_v20, 7 }
 0x349   : > { %v944_v5 = vpop.permute.xlu0 %943  ;;  %v2087_v22 = vadd.s32 8, %v1204_v53 }
 0x34a   : > { %v981_v10 = vpop.permute.xlu1 %980  ;;  %v999_v11 = vsel %vm641_vm5, %v866_v58, %v944_v5 }
 0x34b   : > { %v1013_v34 = vsel %vm658_vm6, %v997_v6, %v981_v10  ;;  %vm1207_vm8 = vcmp.lt.s32.totalorder %v2087_v22, 12 }
 0x34c   : > { %1551 = vmatmul.mubr.msk.bf16.gmra.mxu0 %vm730_vm7, %v1013_v34 }
 0x34d   : > { %v983_v13 = vpop.permute.xlu0 %982 }
 0x34e   : > { %v1015_v62 = vsel %vm658_vm6, %v999_v11, %v983_v13  ;;  %v946_v14 = vpop.permute.xlu1 %945 }
 0x34f   : > { %1554 = vmatprep.mubr.msk.bf16.mxu0 %vm730_vm7, %v1015_v62  ;;  %v1001_v15 = vsel %vm641_vm5, %v2029_v26, %v946_v14 }
 0x352   : > { %v985_v16 = vpop.permute.xlu1 %984 }
 0x353   : > { %v1017_v17 = vsel %vm658_vm6, %v1001_v15, %v985_v16 }
 0x354   : > { %1555 = vmatmul.mubr.msk.bf16.gmra.mxu0 %vm730_vm7, %v1017_v17 }
 0x3fc   : > { %v1544_v19 = vpop.f32.mrf.mxu0 }
 0x3fd   : > { %v1132_v26 = vadd.f32 %v1544_v19, %v2092_v24 }
 0x3fe   : > { %v1123_v21 = vpop.f32.mrf.mxu0 }
 0x3ff   : > { %v1124_v29 = vadd.f32 %v2092_v24, %v1123_v21  ;;  %v1188_v33 = vmax.f32 %v1132_v26, 0.0 }
 0x400   : > { %v1545_v25 = vpop.f32.mrf.mxu0 }
 0x401   : > { %v1135_v27 = vadd.f32 %v1545_v25, %v2092_v24  ;;  %v1186_v9 = vmax.f32 %v1124_v29, 0.0 }
 0x402   : > { %v1126_v28 = vpop.f32.mrf.mxu0 }
 0x403   : > { %v1189_v20 = vmax.f32 %v1135_v27, 0.0  ;;  %v1127_v58 = vadd.f32 %v2092_v24, %v1126_v28 }
 0x404   : > { %v1548_v30 = vpop.f32.mrf.mxu0 }
 0x405   : > { %v1211_v31 = vsel %vm1207_vm8, %v1189_v20, 0.0  ;;  %v1187_v32 = vmax.f32 %v1127_v58, 0.0  ;;  %v1148_v41 = vadd.f32 %v1548_v30, %v2092_v24 }
 0x406   : > { %v1139_v35 = vpop.f32.mrf.mxu0  ;;  %v1231_v39 = vmax.f32 %v1188_v33, %v1211_v31 }
 0x407   : > { %v1209_v37 = vsel %vm1207_vm8, %v1187_v32, 0.0  ;;  %v1140_v42 = vadd.f32 %v2092_v24, %v1139_v35  ;;  %v1192_v43 = vmax.f32 %v1148_v41, 0.0 }
 0x408   : > { %v1549_v40 = vpop.f32.mrf.mxu0  ;;  %v1224_v7 = vmax.f32 %v1186_v9, %v1209_v37  ;;  %v1232_v47 = vrot.slane %v1231_v39, 4 }
 0x409   : > { %v1151_v23 = vadd.f32 %v1549_v40, %v2092_v24  ;;  %v1190_v51 = vmax.f32 %v1140_v42, 0.0 }
 0x40a   : > { %v1142_v44 = vpop.f32.mrf.mxu0  ;;  %v1225_v48 = vrot.slane %v1224_v7, 4  ;;  %v1233_v55 = vmax.f32 %v1231_v39, %v1232_v47 }
 0x40b   : > { %v1193_v45 = vmax.f32 %v1151_v23, 0.0  ;;  %v1143_v46 = vadd.f32 %v2092_v24, %v1142_v44 }
 0x40c   : > { %v1552_v18 = vpop.f32.mrf.mxu0  ;;  %v1226_v60 = vmax.f32 %v1224_v7, %v1225_v48  ;;  %v1234_v3 = vrot.slane %v1233_v55, 2 }
 0x40d   : > { %v1215_v49 = vsel %vm1207_vm8, %v1193_v45, 0.0  ;;  %v1191_v50 = vmax.f32 %v1143_v46, 0.0  ;;  %v1164_v57 = vadd.f32 %v1552_v18, %v2092_v24 }
 0x40e   : > { %v1155_v52 = vpop.f32.mrf.mxu0  ;;  %v1245_v38 = vmax.f32 %v1192_v43, %v1215_v49  ;;  %v1227_v6 = vrot.slane %v1226_v60, 2  ;;  %v1235_v17 = vmax.f32 %v1233_v55, %v1234_v3 }
 0x40f   : > { %v1213_v54 = vsel %vm1207_vm8, %v1191_v50, 0.0  ;;  %v1156_v63 = vadd.f32 %v2092_v24, %v1155_v52  ;;  %v1196_v4 = vmax.f32 %v1164_v57, 0.0 }
 0x410   : > { %v1238_v56 = vmax.f32 %v1190_v51, %v1213_v54  ;;  %v1553_v59 = vpop.f32.mrf.mxu0  ;;  %v1246_v1 = vrot.slane %v1245_v38, 4  ;;  %v1228_v25 = vmax.f32 %v1226_v60, %v1227_v6  ;;  %v1236_v35 = vrot.slane %v1235_v17, 1 }
 0x411   : > { %v1167_v12 = vadd.f32 %v1553_v59, %v2092_v24  ;;  %v1194_v13 = vmax.f32 %v1156_v63, 0.0 }
 0x412   : > { %v1239_v61 = vrot.slane %v1238_v56, 4  ;;  %v1158_v0 = vpop.f32.mrf.mxu0  ;;  %v1247_v15 = vmax.f32 %v1245_v38, %v1246_v1  ;;  %v1229_v37 = vrot.slane %v1228_v25, 1  ;;  %v1237_v38 = vmax.f32 %v1235_v17, %v1236_v35 }
 0x413   : > { %v1197_v8 = vmax.f32 %v1167_v12, 0.0  ;;  %v1159_v2 = vadd.f32 %v2092_v24, %v1158_v0 }
 0x414   : > { %v1240_v36 = vmax.f32 %v1238_v56, %v1239_v61  ;;  %v1556_v5 = vpop.f32.mrf.mxu0  ;;  %v1248_v30 = vrot.slane %v1247_v15, 2  ;;  %v1230_v43 = vmax.f32 %v1228_v25, %v1229_v37 }
 0x415   : > { %v1219_v10 = vsel %vm1207_vm8, %v1197_v8, 0.0  ;;  %v1195_v34 = vmax.f32 %v1159_v2, 0.0  ;;  %v1180_v27 = vadd.f32 %v1556_v5, %v2092_v24 }
 0x416   : > { %v1241_v11 = vrot.slane %v1240_v36, 2  ;;  %v1259_v62 = vmax.f32 %v1196_v4, %v1219_v10  ;;  %v1171_v14 = vpop.f32.mrf.mxu0  ;;  %v1249_v45 = vmax.f32 %v1247_v15, %v1248_v30  ;;  %v1289_v59 = vsel %vm1288_vm9, %v1237_v38, %v1230_v43 }
 0x417   : > { %v1217_v16 = vsel %vm1207_vm8, %v1195_v34, 0.0  ;;  %v1172_v20 = vadd.f32 %v2092_v24, %v1171_v14  ;;  %v1200_v39 = vmax.f32 %v1180_v27, 0.0 }
 0x418   : > { %v1260_v53 = vrot.slane %v1259_v62, 4  ;;  %v1252_v19 = vmax.f32 %v1194_v13, %v1217_v16  ;;  %v1557_v21 = vpop.f32.mrf.mxu0  ;;  %v1242_v28 = vmax.f32 %v1240_v36, %v1241_v11  ;;  %v1250_v54 = vrot.slane %v1249_v45, 1 }
 0x419   : > { %v1183_v26 = vadd.f32 %v1557_v21, %v2092_v24  ;;  %v1198_v42 = vmax.f32 %v1172_v20, 0.0 }
 0x41a   : > { %v1253_v29 = vrot.slane %v1252_v19, 4  ;;  %v1174_v58 = vpop.f32.mrf.mxu0  ;;  %v1261_v31 = vmax.f32 %v1259_v62, %v1260_v53  ;;  %v1243_v41 = vrot.slane %v1242_v28, 1  ;;  %v1251_v63 = vmax.f32 %v1249_v45, %v1250_v54 }
 0x41b   : > { %v1201_v32 = vmax.f32 %v1183_v26, 0.0  ;;  %v1175_v33 = vadd.f32 %v2092_v24, %v1174_v58 }
 0x41c   : > { %v1254_v9 = vmax.f32 %v1252_v19, %v1253_v29  ;;  %v1262_v46 = vrot.slane %v1261_v31, 2  ;;  %v1244_v50 = vmax.f32 %v1242_v28, %v1243_v41 }
 0x41d   : > { %v1202_v40 = vsel %vm412_vm0, %v1201_v32, 0.0  ;;  %v1199_v7 = vmax.f32 %v1175_v33, 0.0  ;;  %vm1290_vm0 = vcmask 1042434  }
 0x41e   : > { %v1255_v23 = vrot.slane %v1254_v9, 2  ;;  %v1223_v44 = vsel %vm1207_vm8, %v1202_v40, 0.0  ;;  %v1263_v55 = vmax.f32 %v1261_v31, %v1262_v46  ;;  %v1291_v22 = vsel %vm1290_vm0, %v1244_v50, %v1289_v59 }
 0x41f   : > { %v1273_v47 = vmax.f32 %v1200_v39, %v1223_v44  ;;  %v1221_v24 = vsel %vm1207_vm8, %v1199_v7, 0.0  ;;  %v1293_v3 = vsel %vm1292_vm10, %v1251_v63, %v1291_v22 }
 0x420   : > { %v1256_v18 = vmax.f32 %v1254_v9, %v1255_v23  ;;  %v1266_v48 = vmax.f32 %v1198_v42, %v1221_v24  ;;  %v1264_v0 = vrot.slane %v1263_v55, 1 }
 0x421   : > { %v1274_v49 = vrot.slane %v1273_v47, 4 }
 0x422   : > { %v1257_v51 = vrot.slane %v1256_v18, 1  ;;  %v1267_v52 = vrot.slane %v1266_v48, 4  ;;  %v1265_v5 = vmax.f32 %v1263_v55, %v1264_v0 }
 0x423   : > { %v1275_v56 = vmax.f32 %v1273_v47, %v1274_v49 }
 0x424   : > { %v1268_v57 = vmax.f32 %v1266_v48, %v1267_v52  ;;  %v1258_v12 = vmax.f32 %v1256_v18, %v1257_v51 }
 0x425   : > { %v1276_v60 = vrot.slane %v1275_v56, 2 }
 0x426   : > { %v1269_v61 = vrot.slane %v1268_v57, 2  ;;  %v1295_v4 = vsel %vm1294_vm11, %v1258_v12, %v1293_v3 }
 0x427   : > { %v1277_v1 = vmax.f32 %v1275_v56, %v1276_v60  ;;  %v1297_v34 = vsel %vm1296_vm12, %v1265_v5, %v1295_v4 }
 0x428   : > { %v1270_v8 = vmax.f32 %v1268_v57, %v1269_v61 }
 0x429   : > { %v1278_v2 = vrot.slane %v1277_v1, 1 }
 0x42a   : > { %v1271_v36 = vrot.slane %v1270_v8, 1 }
 0x42b   : > { %v1279_v10 = vmax.f32 %v1277_v1, %v1278_v2 }
 0x42c   : > { %v1272_v6 = vmax.f32 %v1270_v8, %v1271_v36 }
 0x42e   : > { %v1299_v11 = vsel %vm1298_vm13, %v1272_v6, %v1297_v34 }
 0x42f   : > { %v1301_v13 = vsel %vm1300_vm14, %v1279_v10, %v1299_v11 }
 0x430   : > { %1303 = vst [vmem:[%s245_s26] sm:$0xff] %v1301_v13 }
 0x431   : > { %1636 = shalt.err (!%p1633_p3)
}
 0x432   : > { %s1637_s17 = scalar_lea.hbm %s2135_s10, 128  ;;  %s1641_s18 = scalar_lea.hbm %s2178_s6, 256 }
 0x433   : > { %p1638_p4 = scmp.ne.s32.totalorder %s2135_s10, %s1637_s17  ;;  %p1642_p9 = scmp.lt.s32.totalorder %s2135_s10, %s2178_s6 }
 0x434   : > { %p1643_p10 = scmp.lt.s32.totalorder %s1641_s18, %s1637_s17 }
 0x435   : > { %p1639_p7 = pnand %p1638_p4, %p1763_p5 }
 0x436   : > { %p1644_p11 = por %p1643_p10, %p1642_p9 }
 0x437   : > { %p1640_p8 = pneg %p1639_p7 }
 0x439   : > { %p1645_p12 = pnand %p1644_p11, %p1640_p8 }
 0x43b   : > { %1648 = shalt.err (!%p1645_p12)
}
 0x43c   : > { %1564 = dma.vmem_to_hbm [thread:$0]  (%p1763_p5), %s1319_s28, 128, %s2135_s10, %s1305_s11  }
 0x43d PF: > { %p1570_p13 = scmp.ge.s32.totalorder %s1683_s24, 2  ;;  %s1330_s26 = sand.u32 1, %s1671_s21  }
 0x43e   : > { %s1331_s29 = scalar_lea.sflag [#allocation3], %s1330_s26 }
 0x43f   : > { %p1567_p0 = pnand %p1570_p13, %p1767_p6 }
 0x441   : > { %p1568_p1 = pneg %p1567_p0 }
 0x443   : > { %1666 = dma.done.wait (%p1568_p1), %s1331_s29, 128  }
 0x444   : > { %1668 = vsyncadd (%p1568_p1), %s1331_s29, 4294967168  ;;  %p16_p2 = scmp.ge.s32.totalorder %s1750_s27, 4   ;;  %s2181_s21 = smov %s1675_s22 }
 0x445   : > { %s2182_s22 = smov %s1679_s23  ;;  %s2183_s23 = smov %s1761_s30 }
 0x446   : > { %s2184_s24 = smov %s1750_s27  ;;  %18 = sbr.rel (!%p16_p2) target bundleno = 3 (0x3), region = 79 }
 0x44b   :  { %1336 = vsyncpa [#allocation3], 1 }
 0x44c   :  { %1338 = vsyncpa [#allocation3 + $0x1], 1 }

</bundles_post_ra>
